<compile_context>
chip_gen: v5e
topology: v5e:2x2
jax: 0.10.0
libtpu: 0.0.40
codegen_flags: <defaults>
</compile_context>

<pallas_src>
import jax
import jax.numpy as jnp
from jax.experimental import pallas as pl
from jax.experimental.pallas import tpu as pltpu

LANE = 128              # feature dims padded to lane width
BATCH_TILE_ALIGN = 16   # bf16 packs 16 rows per vreg; keep batch tiles multiples of 16


def _round_up(x, m):
    return (x + m - 1) // m * m


def _make_kernel(num_hidden):
    """Kernel over one batch tile: refs = (x, (w, b) * num_hidden, w_out, b_out, out)."""

    def kernel(*refs):
        x_ref, out_ref = refs[0], refs[-1]
        h = x_ref[...]                                    # bf16 MXU operand
        idx = 1
        for _ in range(num_hidden):
            w_ref, b_ref = refs[idx], refs[idx + 1]
            idx += 2
            z = jnp.dot(h, w_ref[...], preferred_element_type=jnp.float32)
            z = jnp.maximum(z + b_ref[...], 0.0)          # bias + ReLU in f32 (VPU)
            h = z.astype(jnp.bfloat16)                    # dropout = identity at inference
        w_ref, b_ref = refs[idx], refs[idx + 1]
        logits = jnp.dot(h, w_ref[...], preferred_element_type=jnp.float32) + b_ref[...]

        # Padded output columns carry a -1e30 bias (weights there are 0), so exp() underflows
        # to exactly 0 and they never perturb log_softmax; no in-kernel mask needed.
        m = jnp.max(logits, axis=-1, keepdims=True)
        shifted = logits - m
        lse = jnp.log(jnp.sum(jnp.exp(shifted), axis=-1, keepdims=True))
        out_ref[...] = (shifted - lse).astype(out_ref.dtype)

    return kernel


def _resident_spec(shape):
    """Constant-index-map BlockSpec for VMEM-resident weights/biases, single-buffered."""
    try:
        return pl.BlockSpec(shape, lambda i: (0, 0), pipeline_mode=pl.Buffered(1))
    except (TypeError, AttributeError):
        return pl.BlockSpec(shape, lambda i: (0, 0))


def _vmem_budget_and_limit():
    """Generation-aware (VMEM capacity-derived) tile budget and vmem_limit_bytes."""
    cap = 64 << 20
    try:
        cap = int(pltpu.get_tpu_info().vmem_capacity_bytes)
    except Exception:
        pass
    if cap < (32 << 20):
        cap = 64 << 20
    # Leave headroom for Mosaic internal scratch; budget <= limit so they stay consistent.
    limit = min(int(cap * 0.85), cap - (8 << 20))     # v6e/v5e: ~109 MiB, v7x: ~54 MiB
    budget = max(limit - (4 << 20), 16 << 20)
    return budget, limit


def _pick_batch_tile(batch, p_sizes, weight_bytes, budget_bytes):
    """Pick a batch tile that fits VMEM, keeps >=2 grid steps, and minimizes padding waste."""
    p_in, p_out = p_sizes[0], p_sizes[-1]
    # Live intermediates per row: widest adjacent (h bf16, z f32) pair + f32 log_softmax temps.
    pair_bytes = max(2 * a + 4 * b for a, b in zip(p_sizes[:-1], p_sizes[1:]))
    live_per_row = pair_bytes + 8 * p_out
    fixed = weight_bytes                               # single-buffered resident weights

    if fixed > budget_bytes:
        # TODO(synk): tile the contraction (K) dim with an inner pipeline when the weights
        # do not fit VMEM; for now degrade to the minimal batch tile.
        return BATCH_TILE_ALIGN

    tb = BATCH_TILE_ALIGN
    for cand in (4096, 2048, 1024, 512, 256, 128, 64, 32, 16):
        per_tile = 2 * cand * p_in * 2                 # x   (bf16, double-buffered)
        per_tile += 2 * cand * p_out * 4               # out (f32,  double-buffered)
        if fixed + per_tile + cand * live_per_row <= budget_bytes:
            tb = cand
            break

    # Keep enough grid steps for v7x 2-TC sharding and DMA/compute overlap.
    min_steps = 1
    if batch > BATCH_TILE_ALIGN:
        min_steps = 2
    if batch >= 8 * BATCH_TILE_ALIGN:
        min_steps = 4
    tb = min(tb, _round_up(pl.cdiv(batch, min_steps), BATCH_TILE_ALIGN))

    # Shrink tb so b_pad - batch is small (avoid DMA/MXU work on zero padding rows).
    n_steps = max(1, pl.cdiv(batch, tb))
    tb = _round_up(pl.cdiv(batch, n_steps), BATCH_TILE_ALIGN)
    return max(tb, BATCH_TILE_ALIGN)


def nn_classifier_forward(x, params):
    """x: (B, input_size) f32.
    params: {"hidden": [(w, b), ...], "output": (w, b)} with weights in (in, out) layout."""
    B, in_size = x.shape
    hidden = params["hidden"]
    wo, bo = params["output"]
    ws = [w for w, _ in hidden] + [wo]
    bs = [b for _, b in hidden] + [bo]
    sizes = [in_size] + [w.shape[1] for w in ws]
    out_size = sizes[-1]
    psizes = [_round_up(s, LANE) for s in sizes]
    n_layers = len(ws)

    # Pad weights/biases to lane multiples; bf16 weights (MXU), f32 biases (VPU).
    # Output-layer bias padding columns get -1e30 so padded logits vanish in log_softmax.
    wps, bps = [], []
    for li, (w, b) in enumerate(zip(ws, bs)):
        wp = jnp.pad(w, ((0, psizes[li] - w.shape[0]), (0, psizes[li + 1] - w.shape[1])))
        wps.append(wp.astype(jnp.bfloat16))
        pad_val = -1e30 if li == n_layers - 1 else 0.0
        bp = jnp.pad(jnp.reshape(b, (1, -1)),
                     ((0, 0), (0, psizes[li + 1] - b.shape[-1])),
                     constant_values=pad_val)
        bps.append(bp.astype(jnp.float32))

    weight_bytes = sum(w.size * 2 for w in wps) + sum(b.size * 4 for b in bps)
    budget_bytes, vmem_limit = _vmem_budget_and_limit()
    tb = _pick_batch_tile(B, psizes, weight_bytes, budget_bytes)
    b_pad = _round_up(B, tb)

    xp = jnp.pad(x, ((0, b_pad - B), (0, psizes[0] - in_size))).astype(jnp.bfloat16)

    in_specs = [pl.BlockSpec((tb, psizes[0]), lambda i: (i, 0))]    # x: pipelined over batch
    operands = [xp]
    for wp, bp in zip(wps, bps):
        in_specs.append(_resident_spec(wp.shape))                   # weights: VMEM-resident
        in_specs.append(_resident_spec(bp.shape))
        operands += [wp, bp]

    kernel = _make_kernel(num_hidden=len(hidden))

    out = pl.pallas_call(
        kernel,
        out_shape=jax.ShapeDtypeStruct((b_pad, psizes[-1]), jnp.float32),
        grid=(b_pad // tb,),
        in_specs=in_specs,
        out_specs=pl.BlockSpec((tb, psizes[-1]), lambda i: (i, 0)),
        compiler_params=pltpu.CompilerParams(
            dimension_semantics=("parallel",),   # batch tiles shard across v7x's 2 TCs
            vmem_limit_bytes=vmem_limit,
        ),
    )(*operands)

    return out[:B, :out_size]


def init_params(key, input_size, hidden_layers, output_size):
    """PyTorch nn.Linear-style init: U(-1/sqrt(fan_in), 1/sqrt(fan_in)); weights in (in, out)."""
    sizes = [input_size] + list(hidden_layers) + [output_size]
    hidden, out = [], None
    for li, (fan_in, fan_out) in enumerate(zip(sizes[:-1], sizes[1:])):
        key, kw, kb = jax.random.split(key, 3)
        bound = 1.0 / float(fan_in) ** 0.5
        w = jax.random.uniform(kw, (fan_in, fan_out), jnp.float32, -bound, bound)
        b = jax.random.uniform(kb, (fan_out,), jnp.float32, -bound, bound)
        if li < len(hidden_layers):
            hidden.append((w, b))
        else:
            out = (w, b)
    return {"hidden": hidden, "output": out}


def reference_forward(x, params):
    """Pure-JAX f32 reference (eval mode: dropout = identity)."""
    h = x
    for w, b in params["hidden"]:
        h = jnp.maximum(h @ w + b, 0.0)
    wo, bo = params["output"]
    return jax.nn.log_softmax(h @ wo + bo, axis=1)


if __name__ == "__main__":
    # Small shapes consistent with the module: flat feature input, two hidden layers.
    batch = 8
    input_size = 32
    hidden_layers = [64, 32]
    output_size = 16

    key = jax.random.PRNGKey(0)
    key, kx = jax.random.split(key)
    x = jax.random.normal(kx, (batch, input_size), jnp.float32)
    params = init_params(key, input_size, hidden_layers, output_size)

    out = jax.block_until_ready(nn_classifier_forward(x, params))
    ref = reference_forward(x, params)

    assert out.shape == (batch, output_size)
    # log_softmax rows should exp-sum to ~1
    assert jnp.allclose(jnp.sum(jnp.exp(out), axis=1), 1.0, atol=1e-4)
    # bf16 MXU operands with f32 accumulation -> loose tolerance vs f32 reference
    max_err = float(jnp.max(jnp.abs(out - ref)))
    assert max_err < 8e-2, max_err

    print("KERNEL_OK")
</pallas_src>

<mosaic_0001>
module attributes {stable_mosaic.version = 11 : i64} {
  func.func @kernel(%arg0: i32, %arg1: memref<16x128xbf16, #tpu.memory_space<vmem>>, %arg2: memref<128x128xbf16, #tpu.memory_space<vmem>>, %arg3: memref<1x128xf32, #tpu.memory_space<vmem>>, %arg4: memref<128x128xbf16, #tpu.memory_space<vmem>>, %arg5: memref<1x128xf32, #tpu.memory_space<vmem>>, %arg6: memref<128x128xbf16, #tpu.memory_space<vmem>>, %arg7: memref<1x128xf32, #tpu.memory_space<vmem>>, %arg8: memref<16x128xf32, #tpu.memory_space<vmem>>) attributes {dimension_semantics = [#tpu.dimension_semantics<parallel>], iteration_bounds = array<i64: 1>, scalar_prefetch = 0 : i64, scratch_operands = 0 : i64, tpu.core_type = #tpu.core_type<tc>, window_params = [{transform_indices = @transform_0, window_bounds = array<i64: 16, 128>}, {pipeline_mode = #tpu.pipeline_mode<synchronous>, transform_indices = @transform_1, window_bounds = array<i64: 128, 128>}, {pipeline_mode = #tpu.pipeline_mode<synchronous>, transform_indices = @transform_2, window_bounds = array<i64: 1, 128>}, {pipeline_mode = #tpu.pipeline_mode<synchronous>, transform_indices = @transform_3, window_bounds = array<i64: 128, 128>}, {pipeline_mode = #tpu.pipeline_mode<synchronous>, transform_indices = @transform_4, window_bounds = array<i64: 1, 128>}, {pipeline_mode = #tpu.pipeline_mode<synchronous>, transform_indices = @transform_5, window_bounds = array<i64: 128, 128>}, {pipeline_mode = #tpu.pipeline_mode<synchronous>, transform_indices = @transform_6, window_bounds = array<i64: 1, 128>}, {transform_indices = @transform_7, window_bounds = array<i64: 16, 128>}]} {
    %c0 = arith.constant 0 : index
    %c0_0 = arith.constant 0 : index
    %0 = vector.load %arg1[%c0, %c0_0] : memref<16x128xbf16, #tpu.memory_space<vmem>>, vector<16x128xbf16>
    %c0_1 = arith.constant 0 : index
    %c0_2 = arith.constant 0 : index
    %1 = vector.load %arg2[%c0_1, %c0_2] : memref<128x128xbf16, #tpu.memory_space<vmem>>, vector<128x128xbf16>
    %cst = arith.constant dense<0.000000e+00> : vector<16x128xf32>
    %2 = tpu.matmul %0, %1, %cst {dimension_numbers = #tpu.dot_dimension_numbers<[1], [0], [0], [1], [0, 0, 1, 1], [], []>} : vector<16x128xbf16>, vector<128x128xbf16>, vector<16x128xf32> -> vector<16x128xf32>
    %c0_3 = arith.constant 0 : index
    %c0_4 = arith.constant 0 : index
    %3 = vector.load %arg3[%c0_3, %c0_4] : memref<1x128xf32, #tpu.memory_space<vmem>>, vector<1x128xf32>
    %4 = vector.broadcast %3 : vector<1x128xf32> to vector<16x128xf32>
    %5 = arith.addf %2, %4 : vector<16x128xf32>
    %cst_5 = arith.constant 0.000000e+00 : f32
    %6 = vector.broadcast %cst_5 : f32 to vector<16x128xf32>
    %7 = arith.maximumf %5, %6 : vector<16x128xf32>
    %8 = arith.truncf %7 : vector<16x128xf32> to vector<16x128xbf16>
    %c0_6 = arith.constant 0 : index
    %c0_7 = arith.constant 0 : index
    %9 = vector.load %arg4[%c0_6, %c0_7] : memref<128x128xbf16, #tpu.memory_space<vmem>>, vector<128x128xbf16>
    %cst_8 = arith.constant dense<0.000000e+00> : vector<16x128xf32>
    %10 = tpu.matmul %8, %9, %cst_8 {dimension_numbers = #tpu.dot_dimension_numbers<[1], [0], [0], [1], [0, 0, 1, 1], [], []>} : vector<16x128xbf16>, vector<128x128xbf16>, vector<16x128xf32> -> vector<16x128xf32>
    %c0_9 = arith.constant 0 : index
    %c0_10 = arith.constant 0 : index
    %11 = vector.load %arg5[%c0_9, %c0_10] : memref<1x128xf32, #tpu.memory_space<vmem>>, vector<1x128xf32>
    %12 = vector.broadcast %11 : vector<1x128xf32> to vector<16x128xf32>
    %13 = arith.addf %10, %12 : vector<16x128xf32>
    %cst_11 = arith.constant 0.000000e+00 : f32
    %14 = vector.broadcast %cst_11 : f32 to vector<16x128xf32>
    %15 = arith.maximumf %13, %14 : vector<16x128xf32>
    %16 = arith.truncf %15 : vector<16x128xf32> to vector<16x128xbf16>
    %c0_12 = arith.constant 0 : index
    %c0_13 = arith.constant 0 : index
    %17 = vector.load %arg6[%c0_12, %c0_13] : memref<128x128xbf16, #tpu.memory_space<vmem>>, vector<128x128xbf16>
    %cst_14 = arith.constant dense<0.000000e+00> : vector<16x128xf32>
    %18 = tpu.matmul %16, %17, %cst_14 {dimension_numbers = #tpu.dot_dimension_numbers<[1], [0], [0], [1], [0, 0, 1, 1], [], []>} : vector<16x128xbf16>, vector<128x128xbf16>, vector<16x128xf32> -> vector<16x128xf32>
    %c0_15 = arith.constant 0 : index
    %c0_16 = arith.constant 0 : index
    %19 = vector.load %arg7[%c0_15, %c0_16] : memref<1x128xf32, #tpu.memory_space<vmem>>, vector<1x128xf32>
    %20 = vector.broadcast %19 : vector<1x128xf32> to vector<16x128xf32>
    %21 = arith.addf %18, %20 : vector<16x128xf32>
    %cst_17 = arith.constant dense<0xFF800000> : vector<16xf32>
    %22 = vector.multi_reduction <maximumf>, %21, %cst_17 [1] : vector<16x128xf32> to vector<16xf32>
    %23 = vector.shape_cast %22 : vector<16xf32> to vector<16x1xf32>
    %24 = vector.broadcast %23 : vector<16x1xf32> to vector<16x128xf32>
    %25 = arith.subf %21, %24 : vector<16x128xf32>
    %26 = math.exp %25 : vector<16x128xf32>
    %cst_18 = arith.constant dense<0.000000e+00> : vector<16xf32>
    %27 = vector.multi_reduction <add>, %26, %cst_18 [1] : vector<16x128xf32> to vector<16xf32>
    %28 = vector.shape_cast %27 : vector<16xf32> to vector<16x1xf32>
    %29 = math.log %28 : vector<16x1xf32>
    %30 = vector.broadcast %29 : vector<16x1xf32> to vector<16x128xf32>
    %31 = arith.subf %25, %30 : vector<16x128xf32>
    %c0_19 = arith.constant 0 : index
    %c0_20 = arith.constant 0 : index
    %32 = vector.load %arg8[%c0_19, %c0_20] : memref<16x128xf32, #tpu.memory_space<vmem>>, vector<16x128xf32>
    tpu.vector_store %arg8[%c0_19, %c0_20], %31 {strides = array<i32>} : memref<16x128xf32, #tpu.memory_space<vmem>>, vector<16x128xf32>,
    return
  }
  func.func @transform_0(%arg0: i32) -> (i32, i32) {
    %c0_i32 = arith.constant 0 : i32
    %c0_i32_0 = arith.constant 0 : i32
    return %arg0, %c0_i32 : i32, i32
  }
  func.func @transform_1(%arg0: i32) -> (i32, i32) {
    %c0_i32 = arith.constant 0 : i32
    %c0_i32_0 = arith.constant 0 : i32
    %c0_i32_1 = arith.constant 0 : i32
    return %c0_i32, %c0_i32_0 : i32, i32
  }
  func.func @transform_2(%arg0: i32) -> (i32, i32) {
    %c0_i32 = arith.constant 0 : i32
    %c0_i32_0 = arith.constant 0 : i32
    %c0_i32_1 = arith.constant 0 : i32
    return %c0_i32, %c0_i32_0 : i32, i32
  }
  func.func @transform_3(%arg0: i32) -> (i32, i32) {
    %c0_i32 = arith.constant 0 : i32
    %c0_i32_0 = arith.constant 0 : i32
    %c0_i32_1 = arith.constant 0 : i32
    return %c0_i32, %c0_i32_0 : i32, i32
  }
  func.func @transform_4(%arg0: i32) -> (i32, i32) {
    %c0_i32 = arith.constant 0 : i32
    %c0_i32_0 = arith.constant 0 : i32
    %c0_i32_1 = arith.constant 0 : i32
    return %c0_i32, %c0_i32_0 : i32, i32
  }
  func.func @transform_5(%arg0: i32) -> (i32, i32) {
    %c0_i32 = arith.constant 0 : i32
    %c0_i32_0 = arith.constant 0 : i32
    %c0_i32_1 = arith.constant 0 : i32
    return %c0_i32, %c0_i32_0 : i32, i32
  }
  func.func @transform_6(%arg0: i32) -> (i32, i32) {
    %c0_i32 = arith.constant 0 : i32
    %c0_i32_0 = arith.constant 0 : i32
    %c0_i32_1 = arith.constant 0 : i32
    return %c0_i32, %c0_i32_0 : i32, i32
  }
  func.func @transform_7(%arg0: i32) -> (i32, i32) {
    %c0_i32 = arith.constant 0 : i32
    %c0_i32_0 = arith.constant 0 : i32
    return %arg0, %c0_i32 : i32, i32
  }
}

</mosaic_0001>

<bundles_post_ra>
// kernel: tpu_custom_call.1
= control target key start
LH: loop header
LB: loop body
LE: loop exit
PB: predicated region body
PF: predicated region fallthrough
CT: control target
= control target key end

     0   :  { %12 = vsyncpa [#allocation3], 0  ;;  %s739_s0 = inlined_call_operand.hbm [shape: bf16[16,128], index: 0, kind: input, shape index: {}]   ;;  %s740_s1 = inlined_call_operand.hbm [shape: bf16[128,128], index: 1, kind: input, shape index: {}]   ;;  %s741_s2 = inlined_call_operand.vmem [shape: f32[1,128], index: 2, kind: input, shape index: {}]   ;;  %s742_s3 = inlined_call_operand.hbm [shape: bf16[128,128], index: 3, kind: input, shape index: {}]   ;;  %s743_s4 = inlined_call_operand.vmem [shape: f32[1,128], index: 4, kind: input, shape index: {}]   ;;  %s744_s5 = inlined_call_operand.hbm [shape: bf16[128,128], index: 5, kind: input, shape index: {}]   ;;  %s745_s6 = inlined_call_operand.vmem [shape: f32[1,128], index: 6, kind: input, shape index: {}]   ;;  %s746_s7 = inlined_call_operand.hbm [shape: f32[16,128], index: 7, kind: output, shape index: {}]  }
   0x1   :  { %13 = vsyncpa [#allocation6], 0 }
   0x2   :  { %14 = vsyncpa [#allocation9], 0 }
   0x3   :  { %15 = vsyncpa [#allocation4], 0  ;;  %s33_s26 = sshll.u32 %s740_s1, 4  ;;  %s666_s27 = smov [#allocation5]   ;;  %s34_s26 = int_to_ptr.hbm [resolvable:$true] %s33_s26 }
   0x4   :  { %s35_s28 = sshll.u32 %s666_s27, 4  ;;  %s20_s8 = sshll.u32 %s739_s0, 4  ;;  %s36_s28 = int_to_ptr.vmem [resolvable:$true] %s35_s28  ;;  %s21_s8 = int_to_ptr.hbm [resolvable:$true] %s20_s8 }
   0x5   :  { %s667_s9 = smov 64   ;;  %s668_s10 = smov 4  }
   0x6   :  { %41 = dma.hbm_to_vmem [thread:$0]  %s34_s26, 1024, %s36_s28, [#allocation6], %s667_s9, %s667_s9, %s668_s10  }
   0x7   :  { %s669_s11 = smov [#allocation2]   ;;  %s48_s15 = sshll.u32 %s742_s3, 4  ;;  %s49_s15 = int_to_ptr.hbm [resolvable:$true] %s48_s15 }
   0x8   :  { %s22_s12 = sshll.u32 %s669_s11, 4  ;;  %s63_s17 = sshll.u32 %s744_s5, 4  ;;  %s23_s12 = int_to_ptr.vmem [resolvable:$true] %s22_s12  ;;  %s64_s17 = int_to_ptr.hbm [resolvable:$true] %s63_s17 }
   0x9   :  { %28 = dma.hbm_to_vmem [thread:$0]  %s21_s8, 128, %s23_s12, [#allocation3], %s667_s9, %s667_s9, %s668_s10  }
   0xa   :  { %s670_s18 = smov [#allocation7]   ;;  %s671_s0 = smov [#allocation8]  }
   0xb   :  { %s50_s19 = sshll.u32 %s670_s18, 4  ;;  %s65_s20 = sshll.u32 %s671_s0, 4  ;;  %s51_s19 = int_to_ptr.vmem [resolvable:$true] %s50_s19  ;;  %s66_s20 = int_to_ptr.vmem [resolvable:$true] %s65_s20 }
   0xc   :  { %56 = dma.hbm_to_vmem [thread:$0]  %s49_s15, 1024, %s51_s19, [#allocation6], %s667_s9, %s667_s9, %s668_s10  }
   0xd   :  { %71 = dma.hbm_to_vmem [thread:$0]  %s64_s17, 1024, %s66_s20, [#allocation9], %s667_s9, %s667_s9, %s668_s10  }
   0xe   :  { %658 = dma.done.wait [#allocation3], 128  }
   0xf   :  { %659 = vsyncadd [#allocation3], 4294967168 }
  0x10   :  { %660 = dma.done.wait [#allocation6], 2048  }
  0x11   :  { %661 = vsyncadd [#allocation6], 4294965248 }
  0x12   :  { %662 = dma.done.wait [#allocation9], 1024  }
  0x13   :  { %663 = vsyncadd [#allocation9], 4294966272  ;;  %v501_v0 = vld [vmem:[#allocation5 + $0x38] sm:$0xff]  ;;  %v500_v1 = vld [vmem:[#allocation5 + $0x30] sm:$0xff]  ;;  %s378_s26 = sshll.u32 %s746_s7, 4  ;;  %s673_s27 = smov 128   ;;  %s379_s26 = int_to_ptr.hbm [resolvable:$true] %s378_s26 }
  0x14   :  { %166 = vmatpush.bf16.msra.mxu0 %v501_v0  ;;  %v509_v2 = vld [vmem:[#allocation7 + $0x38] sm:$0xff]  ;;  %v508_v3 = vld [vmem:[#allocation7 + $0x30] sm:$0xff]  ;;  %v499_v4 = vld [vmem:[#allocation5 + $0x28] sm:$0xff]  ;;  %s674_s28 = smov 8  }
  0x15   :  { %251 = vmatpush.bf16.msra.mxu1 %v509_v2  ;;  %v507_v5 = vld [vmem:[#allocation7 + $0x28] sm:$0xff]  ;;  %v498_v6 = vld [vmem:[#allocation5 + $0x20] sm:$0xff]  ;;  %v497_v8 = vld [vmem:[#allocation5 + $0x18] sm:$0xff] }
  0x16   :  { %v506_v7 = vld [vmem:[#allocation7 + $0x20] sm:$0xff]  ;;  %v496_v9 = vld [vmem:[#allocation5 + $0x10] sm:$0xff]  ;;  %v495_v10 = vld [vmem:[#allocation5 + $0x8] sm:$0xff] }
  0x17   :  { %v494_v11 = vld [vmem:[#allocation5] sm:$0xff]  ;;  %v493_v12 = vld [vmem:[#allocation2] sm:$0xff]  ;;  %v504_v14 = vld [vmem:[#allocation7 + $0x10] sm:$0xff] }
  0x18   :  { %167 = vmatpush.bf16.msra.mxu0 %v500_v1  ;;  %v505_v13 = vld [vmem:[#allocation7 + $0x18] sm:$0xff]  ;;  %v503_v15 = vld [vmem:[#allocation7 + $0x8] sm:$0xff]  ;;  %v502_v16 = vld [vmem:[#allocation7] sm:$0xff] }
  0x19   :  { %252 = vmatpush.bf16.msra.mxu1 %v508_v3  ;;  %v517_v17 = vld [vmem:[#allocation8 + $0x38] sm:$0xff]  ;;  %v516_v18 = vld [vmem:[#allocation8 + $0x30] sm:$0xff]  ;;  %v515_v19 = vld [vmem:[#allocation8 + $0x28] sm:$0xff] }
  0x1a   :  { %336 = vmatpush.bf16.msra.mxu2 %v517_v17  ;;  %v514_v20 = vld [vmem:[#allocation8 + $0x20] sm:$0xff]  ;;  %v527_v22 = vld [vmem:[%s741_s2] ss:$0 sm:$0xff]  ;;  %v512_v30 = vld [vmem:[#allocation8 + $0x10] sm:$0xff] }
  0x1b   :  { %v513_v29 = vld [vmem:[#allocation8 + $0x18] sm:$0xff]  ;;  %v511_v31 = vld [vmem:[#allocation8 + $0x8] sm:$0xff]  ;;  %v510_v32 = vld [vmem:[#allocation8] sm:$0xff] }
  0x1c   :  { %168 = vmatpush.bf16.msra.mxu0 %v499_v4  ;;  %v528_v34 = vld [vmem:[%s743_s4] ss:$0 sm:$0xff]  ;;  %s672_s4 = smov [#allocation10]  }
  0x1d   :  { %253 = vmatpush.bf16.msra.mxu1 %v507_v5  ;;  %v529_v41 = vld [vmem:[%s745_s6] ss:$0 sm:$0xff]  ;;  %s376_s6 = sshll.u32 %s672_s4, 4  ;;  %s377_s6 = int_to_ptr.vmem [resolvable:$true] %s376_s6 }
  0x1e   :  { %337 = vmatpush.bf16.msra.mxu2 %v516_v18 }
  0x20   :  { %169 = vmatpush.bf16.msra.mxu0 %v498_v6 }
  0x21   :  { %254 = vmatpush.bf16.msra.mxu1 %v506_v7 }
  0x22   :  { %338 = vmatpush.bf16.msra.mxu2 %v515_v19 }
  0x24   :  { %170 = vmatpush.bf16.msra.mxu0 %v497_v8 }
  0x25   :  { %255 = vmatpush.bf16.msra.mxu1 %v505_v13 }
  0x26   :  { %339 = vmatpush.bf16.msra.mxu2 %v514_v20 }
  0x28   :  { %171 = vmatpush.bf16.msra.mxu0 %v496_v9 }
  0x29   :  { %256 = vmatpush.bf16.msra.mxu1 %v504_v14 }
  0x2a   :  { %340 = vmatpush.bf16.msra.mxu2 %v513_v29 }
  0x2c   :  { %172 = vmatpush.bf16.msra.mxu0 %v495_v10 }
  0x2d   :  { %257 = vmatpush.bf16.msra.mxu1 %v503_v15 }
  0x2e   :  { %341 = vmatpush.bf16.msra.mxu2 %v512_v30 }
  0x30   :  { %173 = vmatpush.bf16.msra.mxu0 %v494_v11 }
  0x31   :  { %258 = vmatpush.bf16.msra.mxu1 %v502_v16 }
  0x32   :  { %342 = vmatpush.bf16.msra.mxu2 %v511_v31 }
  0x33   :  { %174 = vmatmul.bf16.vlgmr.msra.gmra.mxu0 %v493_v12 }
  0x36   :  { %343 = vmatpush.bf16.msra.mxu2 %v510_v32 }
  0xb0   :  { %v175_v21 = vpop.f32.mrf.mxu0 }
  0xb1   :  { %v176_v23 = vadd.f32 %v527_v22, %v175_v21 }
  0xb3   :  { %v180_v26 = vmax.f32 %v176_v23, 0.0 }
  0xb8   :  { %v177_v24 = vpop.f32.mrf.mxu0 }
  0xb9   :  { %v178_v25 = vadd.f32 %v527_v22, %v177_v24 }
  0xbb   :  { %v181_v27 = vmax.f32 %v178_v25, 0.0 }
  0xbd   :  { %v182_v28 = vpack.c.bf16 %v181_v27, %v180_v26 }
  0xbf   :  { %259 = vmatmul.bf16.vlgmr.msra.gmra.mxu1 %v182_v28 }
 0x13c   :  { %v260_v33 = vpop.f32.mrf.mxu1 }
 0x13d   :  { %v261_v35 = vadd.f32 %v528_v34, %v260_v33 }
 0x13f   :  { %v265_v38 = vmax.f32 %v261_v35, 0.0 }
 0x144   :  { %v262_v36 = vpop.f32.mrf.mxu1 }
 0x145   :  { %v263_v37 = vadd.f32 %v528_v34, %v262_v36 }
 0x147   :  { %v266_v39 = vmax.f32 %v263_v37, 0.0 }
 0x149   :  { %v267_v40 = vpack.c.bf16 %v266_v39, %v265_v38 }
 0x14b   :  { %344 = vmatmul.bf16.vlgmr.msra.gmra.mxu2 %v267_v40 }
 0x1ce   :  { %v345_v42 = vpop.f32.mrf.mxu2 }
 0x1cf   :  { %v346_v43 = vadd.f32 %v529_v41, %v345_v42 }
 0x1d1   :  { %350 = vmax.xlane.f32.xlu0 %v346_v43 }
 0x1d6   :  { %v347_v44 = vpop.f32.mrf.mxu2 }
 0x1d7   :  { %v348_v45 = vadd.f32 %v529_v41, %v347_v44 }
 0x1d9   :  { %352 = vmax.xlane.f32.xlu0 %v348_v45 }
 0x244   :  { %v351_v46 = vpop.xlane.xlu0 %350 }
 0x245   :  { %v354_v47 = vsub.f32 %v346_v43, %v351_v46 }
 0x247   :  { %v356_v48 = vmul.f32 1.442695, %v354_v47 }
 0x249   :  { %530 = vpow2.f32 %v356_v48 }
 0x24c   :  { %v353_v49 = vpop.xlane.xlu0 %352 }
 0x24d   :  { %v355_v50 = vsub.f32 %v348_v45, %v353_v49 }
 0x24f   :  { %v531_v51 = vpop.eup %530  ;;  %v358_v52 = vmul.f32 1.442695, %v355_v50 }
 0x250   :  { %360 = vadd.xlane.f32.xlu1 %v531_v51 }
 0x251   :  { %532 = vpow2.f32 %v358_v52 }
 0x257   :  { %v533_v53 = vpop.eup %532 }
 0x258   :  { %362 = vadd.xlane.f32.xlu1 %v533_v53 }
 0x2c3   :  { %v361_v54 = vpop.xlane.xlu1 %360 }
 0x2c4   :  { %534 = vlog2.f32 %v361_v54 }
 0x2ca   :  { %v535_v55 = vpop.eup %534 }
 0x2cb   :  { %v365_v56 = vmul.f32 0.6931472, %v535_v55  ;;  %v363_v57 = vpop.xlane.xlu1 %362 }
 0x2cc   :  { %536 = vlog2.f32 %v363_v57 }
 0x2cd   :  { %v368_v58 = vsub.f32 %v354_v47, %v365_v56 }
 0x2cf   :  { %370 = vst [vmem:[#allocation10] sm:$0xff] %v368_v58 }
 0x2d2   :  { %v537_v59 = vpop.eup %536 }
 0x2d3   :  { %v367_v60 = vmul.f32 0.6931472, %v537_v59 }
 0x2d5   :  { %v369_v61 = vsub.f32 %v355_v50, %v367_v60 }
 0x2d7   :  { %371 = vst [vmem:[#allocation10 + $0x8] sm:$0xff] %v369_v61 }
 0x2d8   :  { %384 = dma.vmem_to_hbm [thread:$0]  %s377_s6, 256, %s379_s26, [#allocation4], %s673_s27, %s673_s27, %s674_s28  }
 0x2d9   :  { %664 = dma.done.wait [#allocation4], 256  }
 0x2da   :  { %665 = vsyncadd [#allocation4], 4294967040 }
 0x2db   :  { %389 = vsyncpa [#allocation3], 1 }
 0x2dc   :  { %390 = vsyncpa [#allocation6], 1 }
 0x2dd   :  { %391 = vsyncpa [#allocation9], 1 }
 0x2de   :  { %392 = vsyncpa [#allocation4], 1 }

</bundles_post_ra>
